<compile_context>
chip_gen: v5e
topology: v5e:2x2
jax: 0.10.0
libtpu: 0.0.40
codegen_flags: <defaults>
</compile_context>

<pallas_src>
import functools

import jax
import jax.numpy as jnp
from jax.experimental import pallas as pl
from jax.experimental.pallas import tpu as pltpu


# --------------------------------- kernels ----------------------------------

def _conv_bn_relu6_up2_single(x_ref, w_ref, b_ref, e_ref, o_ref):
    """One grid step == one expansion chunk (no scratch, no inner loop).

    x_ref: (1, Cin, L)     input rows, spatial flattened on lanes (L = BH*W)
    w_ref: (Cout, Cin)     1x1 conv weight with BN scale folded in
    b_ref: (Cout, 1)       folded BN bias (f32)
    e_ref: (L, 4*L)        block-diagonal 0/1 nearest-neighbour expansion
    o_ref: (1, Cout, 4*L)  upsampled output row pairs, flattened on lanes
    """
    y = jnp.dot(w_ref[...], x_ref[0], preferred_element_type=jnp.float32)   # 1x1 conv
    y = jnp.clip(y + b_ref[...], 0.0, 6.0).astype(e_ref.dtype)              # BN + ReLU6
    z = jnp.dot(y, e_ref[...], preferred_element_type=jnp.float32)          # 2x NN upsample
    o_ref[0] = z.astype(o_ref.dtype)                                        # one wide store


def _conv_bn_relu6_up2_chunked(x_ref, w_ref, b_ref, e_ref, o_ref, y_ref, *,
                               num_chunks, chunk_lanes):
    """Fallback: BH rows per step, expansion done in `num_chunks` R-row sub-chunks."""
    y = jnp.dot(w_ref[...], x_ref[0], preferred_element_type=jnp.float32)
    y_ref[...] = jnp.clip(y + b_ref[...], 0.0, 6.0).astype(y_ref.dtype)
    e = e_ref[...]
    out_lanes = 4 * chunk_lanes

    def body(i, carry):
        yi = y_ref[:, pl.ds(pl.multiple_of(i * chunk_lanes, chunk_lanes), chunk_lanes)]
        zi = jnp.dot(yi, e, preferred_element_type=jnp.float32)
        o_ref[0, :, pl.ds(pl.multiple_of(i * out_lanes, out_lanes), out_lanes)] = (
            zi.astype(o_ref.dtype))
        return carry

    jax.lax.fori_loop(0, num_chunks, body, 0, unroll=2)


# --------------------------------- tiling -----------------------------------

def _pick_tiling(N, Cin, Cout, H, W, *, itemsize=4,
                 max_chunk_lanes=512, vmem_budget=20 * 1024 * 1024):
    """Choose (BH rows per grid step, R rows per expansion chunk)."""

    def est(bh, r, with_scratch):
        lanes, chunk = bh * W, r * W
        b = 2 * Cin * lanes * itemsize            # double-buffered input block
        b += 2 * Cout * 4 * lanes * itemsize      # double-buffered 4x output block
        b += 4 * chunk * chunk * itemsize         # resident block-diagonal expansion
        b += 2 * Cout * Cin * itemsize            # folded conv weight
        if with_scratch:
            b += Cout * lanes * itemsize          # y scratch
        return b

    # Regime A (preferred): one lane-aligned chunk per grid step.
    aligned = [bh for bh in range(1, H + 1)
               if H % bh == 0
               and (bh * W) % 128 == 0
               and bh * W <= max_chunk_lanes
               and est(bh, bh, False) <= vmem_budget]
    if aligned:
        # Prefer enough grid steps to overlap the 4x output writeback and keep
        # both v7x TensorCores busy; within that, the largest chunk (largest K).
        for min_steps in (4, 2, 1):
            ok = [bh for bh in aligned if N * (H // bh) >= min_steps]
            if ok:
                bh = max(ok)
                return bh, bh

    # Regime B: full image per step (block == full dims is always legal);
    # expansion runs in R-row sub-chunks inside the kernel.
    divisors = [r for r in range(1, H + 1) if H % r == 0 and r * W <= max_chunk_lanes]
    r = max(divisors) if divisors else 1
    return H, r


# --------------------------------- wrapper -----------------------------------

def upsample_forward(x_nchw, conv_w, bn_gamma, bn_beta, bn_mean, bn_var, eps=1e-5):
    """x_nchw: (N, Cin, H, W); conv_w: (Cout, Cin, 1, 1) -> (N, Cout, 2H, 2W)."""
    N, Cin, H, W = x_nchw.shape
    Cout = conv_w.shape[0]
    out_dtype = x_nchw.dtype
    # bf16 inputs: run both MXU dots in bf16 (0/1 expansion is exact) with f32 accum.
    mxu_dtype = jnp.bfloat16 if out_dtype == jnp.bfloat16 else jnp.float32

    # Fold eval-mode BatchNorm into the 1x1 conv: scale into weight, shift into bias.
    inv_std = jax.lax.rsqrt(bn_var.astype(jnp.float32) + eps)
    scale = bn_gamma.astype(jnp.float32) * inv_std                              # (Cout,)
    w_mat = (conv_w[:, :, 0, 0].astype(jnp.float32) * scale[:, None]).astype(mxu_dtype)
    bias = (bn_beta.astype(jnp.float32) - bn_mean.astype(jnp.float32) * scale)
    bias = bias.reshape(Cout, 1)                                                # f32

    BH, R = _pick_tiling(N, Cin, Cout, H, W)
    num_chunks = BH // R
    chunk_lanes = R * W

    # Block-diagonal 0/1 expansion: y (Cout, R*W) @ E (R*W, 4*R*W) yields, per input
    # row, both nearest-neighbour output rows (W-interleaved) laid out contiguously.
    e1 = jnp.repeat(jnp.eye(W, dtype=jnp.float32), 2, axis=1)                   # (W, 2W)
    e2 = jnp.concatenate([e1, e1], axis=1)                                      # (W, 4W)
    e_chunk = jnp.kron(jnp.eye(R, dtype=jnp.float32), e2).astype(mxu_dtype)     # (RW, 4RW)

    # Free contiguous reshape: flatten spatial onto the lane axis (no transpose).
    x_flat = x_nchw.reshape(N, Cin, H * W)
    grid = (N, H // BH)

    in_specs = [
        pl.BlockSpec((1, Cin, BH * W), lambda n, t: (n, 0, t)),
        pl.BlockSpec((Cout, Cin), lambda n, t: (0, 0)),
        pl.BlockSpec((Cout, 1), lambda n, t: (0, 0)),
        pl.BlockSpec((chunk_lanes, 4 * chunk_lanes), lambda n, t: (0, 0)),
    ]
    out_spec = pl.BlockSpec((1, Cout, 4 * BH * W), lambda n, t: (n, 0, t))

    if num_chunks == 1:
        kernel = _conv_bn_relu6_up2_single
        scratch = ()
    else:
        kernel = functools.partial(_conv_bn_relu6_up2_chunked,
                                   num_chunks=num_chunks, chunk_lanes=chunk_lanes)
        scratch = (pltpu.VMEM((Cout, BH * W), mxu_dtype),)

    out_flat = pl.pallas_call(
        kernel,
        out_shape=jax.ShapeDtypeStruct((N, Cout, 4 * H * W), out_dtype),
        grid_spec=pltpu.PrefetchScalarGridSpec(
            num_scalar_prefetch=0,
            grid=grid,
            in_specs=in_specs,
            out_specs=out_spec,
            scratch_shapes=scratch,
        ),
        compiler_params=pltpu.CompilerParams(
            dimension_semantics=("parallel", "parallel"),
            vmem_limit_bytes=32 * 1024 * 1024,
        ),
    )(x_flat, w_mat, bias, e_chunk)

    # Free contiguous reshape back to NCHW (N, Cout, 2H, 2W) — no transpose.
    return out_flat.reshape(N, Cout, 2 * H, 2 * W)


# -------------------------------- reference ----------------------------------

def _reference(x, conv_w, gamma, beta, mean, var, eps=1e-5):
    # pure-JAX reference replicating the PyTorch forward (eval-mode BN)
    y = jnp.einsum('nchw,oc->nohw', x, conv_w[:, :, 0, 0])
    y = (y - mean[None, :, None, None]) / jnp.sqrt(var[None, :, None, None] + eps)
    y = y * gamma[None, :, None, None] + beta[None, :, None, None]
    y = jnp.clip(y, 0.0, 6.0)
    y = jnp.repeat(jnp.repeat(y, 2, axis=2), 2, axis=3)
    return y


if __name__ == "__main__":
    key = jax.random.PRNGKey(0)
    kx, kw, kg, kb, km, kv = jax.random.split(key, 6)

    N, Cin, Cout, H, W = 2, 4, 8, 16, 16
    x = jax.random.normal(kx, (N, Cin, H, W), dtype=jnp.float32)

    # deterministic synthetic parameters (shapes match nn.Conv2d / nn.BatchNorm2d)
    conv_w = 0.1 * jax.random.normal(kw, (Cout, Cin, 1, 1), dtype=jnp.float32)
    gamma = 1.0 + 0.1 * jax.random.normal(kg, (Cout,), dtype=jnp.float32)
    beta = 0.1 * jax.random.normal(kb, (Cout,), dtype=jnp.float32)
    mean = 0.1 * jax.random.normal(km, (Cout,), dtype=jnp.float32)
    var = jnp.abs(jax.random.normal(kv, (Cout,), dtype=jnp.float32)) + 0.5

    out = jax.jit(upsample_forward)(x, conv_w, gamma, beta, mean, var)
    out = jax.block_until_ready(out)

    ref = _reference(x, conv_w, gamma, beta, mean, var)
    assert out.shape == (N, Cout, 2 * H, 2 * W), out.shape
    assert jnp.allclose(out, ref, atol=1e-4, rtol=1e-4), "mismatch vs reference"
    print("KERNEL_OK")
</pallas_src>

<mosaic_0001>
module attributes {stable_mosaic.version = 11 : i64} {
  func.func @_conv_bn_relu6_up2_single(%arg0: i32, %arg1: i32, %arg2: memref<1x4x128xf32, #tpu.memory_space<vmem>>, %arg3: memref<8x4xf32, #tpu.memory_space<vmem>>, %arg4: memref<8x1xf32, #tpu.memory_space<vmem>>, %arg5: memref<128x512xf32, #tpu.memory_space<vmem>>, %arg6: memref<1x8x512xf32, #tpu.memory_space<vmem>>) attributes {dimension_semantics = [#tpu.dimension_semantics<parallel>, #tpu.dimension_semantics<parallel>], iteration_bounds = array<i64: 2, 2>, scalar_prefetch = 0 : i64, scratch_operands = 0 : i64, tpu.core_type = #tpu.core_type<tc>, window_params = [{transform_indices = @transform_0, window_bounds = array<i64: 1, 4, 128>}, {pipeline_mode = #tpu.pipeline_mode<synchronous>, transform_indices = @transform_1, window_bounds = array<i64: 8, 4>}, {pipeline_mode = #tpu.pipeline_mode<synchronous>, transform_indices = @transform_2, window_bounds = array<i64: 8, 1>}, {pipeline_mode = #tpu.pipeline_mode<synchronous>, transform_indices = @transform_3, window_bounds = array<i64: 128, 512>}, {transform_indices = @transform_4, window_bounds = array<i64: 1, 8, 512>}]} {
    %c0 = arith.constant 0 : index
    %c0_0 = arith.constant 0 : index
    %0 = vector.load %arg3[%c0, %c0_0] : memref<8x4xf32, #tpu.memory_space<vmem>>, vector<8x4xf32>
    %c0_1 = arith.constant 0 : index
    %c0_2 = arith.constant 0 : index
    %c0_3 = arith.constant 0 : index
    %1 = vector.load %arg2[%c0_1, %c0_2, %c0_3] : memref<1x4x128xf32, #tpu.memory_space<vmem>>, vector<1x4x128xf32>
    %2 = vector.shape_cast %1 : vector<1x4x128xf32> to vector<4x128xf32>
    %cst = arith.constant dense<0.000000e+00> : vector<8x128xf32>
    %3 = tpu.matmul %0, %2, %cst {dimension_numbers = #tpu.dot_dimension_numbers<[1], [0], [0], [1], [0, 0, 1, 1], [], []>} : vector<8x4xf32>, vector<4x128xf32>, vector<8x128xf32> -> vector<8x128xf32>
    %c0_4 = arith.constant 0 : index
    %c0_5 = arith.constant 0 : index
    %4 = vector.load %arg4[%c0_4, %c0_5] : memref<8x1xf32, #tpu.memory_space<vmem>>, vector<8x1xf32>
    %5 = vector.broadcast %4 : vector<8x1xf32> to vector<8x128xf32>
    %6 = arith.addf %3, %5 : vector<8x128xf32>
    %cst_6 = arith.constant 0.000000e+00 : f32
    %cst_7 = arith.constant 6.000000e+00 : f32
    %7 = vector.broadcast %cst_6 : f32 to vector<8x128xf32>
    %8 = arith.maximumf %7, %6 : vector<8x128xf32>
    %9 = vector.broadcast %cst_7 : f32 to vector<8x128xf32>
    %10 = arith.minimumf %9, %8 : vector<8x128xf32>
    %c0_8 = arith.constant 0 : index
    %c0_9 = arith.constant 0 : index
    %11 = vector.load %arg5[%c0_8, %c0_9] : memref<128x512xf32, #tpu.memory_space<vmem>>, vector<128x512xf32>
    %cst_10 = arith.constant dense<0.000000e+00> : vector<8x512xf32>
    %12 = tpu.matmul %10, %11, %cst_10 {dimension_numbers = #tpu.dot_dimension_numbers<[1], [0], [0], [1], [0, 0, 1, 1], [], []>} : vector<8x128xf32>, vector<128x512xf32>, vector<8x512xf32> -> vector<8x512xf32>
    %c0_11 = arith.constant 0 : index
    %c0_12 = arith.constant 0 : index
    %c0_13 = arith.constant 0 : index
    %13 = vector.load %arg6[%c0_11, %c0_12, %c0_13] : memref<1x8x512xf32, #tpu.memory_space<vmem>>, vector<1x8x512xf32>
    %14 = vector.shape_cast %13 : vector<1x8x512xf32> to vector<8x512xf32>
    %15 = vector.shape_cast %12 : vector<8x512xf32> to vector<1x8x512xf32>
    tpu.vector_store %arg6[%c0_11, %c0_12, %c0_13], %15 {strides = array<i32>} : memref<1x8x512xf32, #tpu.memory_space<vmem>>, vector<1x8x512xf32>,
    return
  }
  func.func @transform_0(%arg0: i32, %arg1: i32) -> (i32, i32, i32) {
    %c0_i32 = arith.constant 0 : i32
    %c0_i32_0 = arith.constant 0 : i32
    return %arg0, %c0_i32, %arg1 : i32, i32, i32
  }
  func.func @transform_1(%arg0: i32, %arg1: i32) -> (i32, i32) {
    %c0_i32 = arith.constant 0 : i32
    %c0_i32_0 = arith.constant 0 : i32
    %c0_i32_1 = arith.constant 0 : i32
    return %c0_i32, %c0_i32_0 : i32, i32
  }
  func.func @transform_2(%arg0: i32, %arg1: i32) -> (i32, i32) {
    %c0_i32 = arith.constant 0 : i32
    %c0_i32_0 = arith.constant 0 : i32
    %c0_i32_1 = arith.constant 0 : i32
    return %c0_i32, %c0_i32_0 : i32, i32
  }
  func.func @transform_3(%arg0: i32, %arg1: i32) -> (i32, i32) {
    %c0_i32 = arith.constant 0 : i32
    %c0_i32_0 = arith.constant 0 : i32
    %c0_i32_1 = arith.constant 0 : i32
    return %c0_i32, %c0_i32_0 : i32, i32
  }
  func.func @transform_4(%arg0: i32, %arg1: i32) -> (i32, i32, i32) {
    %c0_i32 = arith.constant 0 : i32
    %c0_i32_0 = arith.constant 0 : i32
    return %arg0, %c0_i32, %arg1 : i32, i32, i32
  }
}

</mosaic_0001>

<bundles_post_ra>
// kernel: upsample_forward.1
= control target key start
LH: loop header
LB: loop body
LE: loop exit
PB: predicated region body
PF: predicated region fallthrough
CT: control target
= control target key end

     0   :  { %s630_s15 = smov 0   ;;  %s632_s16 = smov 0   ;;  %s888_s0 = inlined_call_operand.vmem [shape: f32[2,4,256], index: 0, kind: input, shape index: {}]   ;;  %s889_s1 = inlined_call_operand.vmem [shape: f32[8,4], index: 1, kind: input, shape index: {}]   ;;  %s890_s2 = inlined_call_operand.vmem [shape: f32[8,1], index: 2, kind: input, shape index: {}]   ;;  %s891_s3 = inlined_call_operand.vmem [shape: f32[128,512], index: 3, kind: input, shape index: {}]   ;;  %s892_s4 = inlined_call_operand.vmem [shape: f32[2,8,1024], index: 4, kind: output, shape index: {}]  }
   0x1   :  { %s634_s17 = smov 0   ;;  %s636_s18 = smov 0  }
   0x2   :  { %s638_s19 = smov 0  }
   0x3 LB: > { %s23_s20 = sadd.s32 1, %s594_s17  ;;  %s26_s21 = sadd.s32 1, %s598_s18  ;;  %s602_s19 = sphi %s638_s19, %s14_s19   ;;  %s598_s18 = sphi %s636_s18, %s896_s18   ;;  %s594_s17 = sphi %s634_s17, %s895_s17   ;;  %s590_s16 = sphi %s632_s16, %s894_s16   ;;  %s586_s15 = sphi %s630_s15, %s893_s15  }
   0x4   : > { %p24_p0 = scmp.ge.s32.totalorder %s23_s20, 2  ;;  %p512_p1 = scmp.ge.s32.totalorder %s602_s19, 1 }
   0x5   : > { %p181_p2 = scmp.lt.s32.totalorder %s602_s19, 5 }
   0x6   : > { %s898_s20 = smov (%p24_p0, %s23_s20), 0  ;;  %s900_s21 = smov (!%p24_p0, %s26_s21), %s598_s18 }
   0x7   : > { %p182_p3 = pnand %p512_p1, %p181_p2  ;;  %p28_p4 = scmp.ge.s32.totalorder %s900_s21, 2 }
   0x8   : > { %p214_p5 = scmp.lt.s32.totalorder (!%p182_p3), %s590_s16, 1  ;;  %p216_p6 = scmp.lt.s32.totalorder (!%p182_p3), %s586_s15, 1 }
   0x9   : > { %s902_s21 = smov (%p28_p4, %s900_s21), 0  ;;  %185 = sbr.rel (%p182_p3) target bundleno = 289 (0x121), region = 36 }
   0xe   : > { %v604_v0 = vmov 0   ;;  %v234_v1 = vld [vmem:[%s890_s2] sm:$0xff]  ;;  %v331_v3 = vld [vmem:[%s891_s3 + $0x1e8] sm:$0xff]  ;;  %s904_s16 = smov (!%p214_p5, %s590_s16), 1  ;;  %v332_v4 = vld [vmem:[%s891_s3 + $0x1f0] sm:$0xff]  ;;  %vm244_vm0 = vcmask 1043456  }
   0xf   : > { %563 = vset.pattern.permute.xlu0 %v604_v0  ;;  %v330_v2 = vld [vmem:[%s891_s3 + $0x1e0] sm:$0xff]  ;;  %s217_s6 = scalar_select %p216_p6, %s586_s15, 1  ;;  %354 = vmatpush.msra.mxu2 %v331_v3  ;;  %v327_v6 = vld [vmem:[%s891_s3 + $0x1c8] sm:$0xff]  ;;  %v328_v7 = vld [vmem:[%s891_s3 + $0x1d0] sm:$0xff]  ;;  %vm240_vm1 = vcmask 31744  }
  0x10   : > { %237 = vperm.xlu0 %563, %v234_v1   ;;  %334 = vmatpush.msra.mxu1 %v330_v2  ;;  %v326_v5 = vld [vmem:[%s891_s3 + $0x1c0] sm:$0xff]  ;;  %s513_s11 = sshll.u32 %s904_s16, 1  ;;  %v323_v9 = vld [vmem:[%s891_s3 + $0x1a8] sm:$0xff]  ;;  %v324_v10 = vld [vmem:[%s891_s3 + $0x1b0] sm:$0xff]  ;;  %s516_s29 = sshll.u32 %s904_s16, 3 }
  0x11   : > { %374 = vmatpush.msra.mxu3 %v332_v4  ;;  %v322_v8 = vld [vmem:[%s891_s3 + $0x1a0] sm:$0xff]  ;;  %s219_s25 = sadd.s32 %s513_s11, %s217_s6  ;;  %355 = vmatpush.msra.mxu2 %v327_v6  ;;  %v319_v12 = vld [vmem:[%s891_s3 + $0x188] sm:$0xff]  ;;  %v320_v14 = vld [vmem:[%s891_s3 + $0x190] sm:$0xff] }
  0x12   : > { %335 = vmatpush.msra.mxu1 %v326_v5  ;;  %v318_v11 = vld [vmem:[%s891_s3 + $0x180] sm:$0xff]  ;;  %s514_s28 = sshll.u32 %s219_s25, 2  ;;  %v333_v16 = vld [vmem:[%s891_s3 + $0x1f8] sm:$0xff]  ;;  %v315_v18 = vld [vmem:[%s891_s3 + $0x168] sm:$0xff] }
  0x13   : > { %375 = vmatpush.msra.mxu3 %v328_v7  ;;  %s221_s8 = scalar_lea.vmem %s888_s0, %s514_s28  ;;  %v232_v13 = vld [vmem:[%s889_s1] sm:$0xff]  ;;  %356 = vmatpush.msra.mxu2 %v323_v9  ;;  %v316_v19 = vld [vmem:[%s891_s3 + $0x170] sm:$0xff]  ;;  %v329_v20 = vld [vmem:[%s891_s3 + $0x1d8] sm:$0xff]  ;;  %s515_s28 = sshll.u32 %s586_s15, 2 }
  0x14   : > { %336 = vmatpush.msra.mxu1 %v322_v8  ;;  %v233_v15 = vld [vmem:[%s221_s8] sm:$0xf]  ;;  %v311_v22 = vld [vmem:[%s891_s3 + $0x148] sm:$0xff]  ;;  %v312_v23 = vld [vmem:[%s891_s3 + $0x150] sm:$0xff]  ;;  %p225_p7 = scmp.lt.s32.totalorder %s515_s28, 7 }
  0x15   : > { %376 = vmatpush.msra.mxu3 %v324_v10  ;;  %v314_v17 = vld [vmem:[%s891_s3 + $0x160] sm:$0xff]  ;;  %518 = vmatpush.msk.msra.mxu0 %vm244_vm0, %v233_v15  ;;  %v325_v24 = vld [vmem:[%s891_s3 + $0x1b8] sm:$0xff]  ;;  %v307_v26 = vld [vmem:[%s891_s3 + $0x128] sm:$0xff] }
  0x16   : > { %337 = vmatpush.msra.mxu1 %v318_v11  ;;  %357 = vmatpush.msra.mxu2 %v319_v12  ;;  %v310_v21 = vld [vmem:[%s891_s3 + $0x140] sm:$0xff]  ;;  %v308_v27 = vld [vmem:[%s891_s3 + $0x130] sm:$0xff]  ;;  %v321_v28 = vld [vmem:[%s891_s3 + $0x198] sm:$0xff]  ;;  %s906_s28 = smov (!%p225_p7, %s515_s28), 7 }
  0x17   : > { %519 = vmatmul.msk.f32.vlgmr.msra.gmra.mxu0 %vm240_vm1, %v232_v13  ;;  %377 = vmatpush.msra.mxu3 %v320_v14  ;;  %v306_v25 = vld [vmem:[%s891_s3 + $0x120] sm:$0xff]  ;;  %v303_v30 = vld [vmem:[%s891_s3 + $0x108] sm:$0xff]  ;;  %v304_v31 = vld [vmem:[%s891_s3 + $0x110] sm:$0xff]  ;;  %s228_s30 = sadd.s32 %s516_s29, %s906_s28 }
  0x18   : > { %394 = vmatpush.msrb.mxu0 %v333_v16  ;;  %338 = vmatpush.msra.mxu1 %v314_v17  ;;  %v302_v29 = vld [vmem:[%s891_s3 + $0x100] sm:$0xff]  ;;  %v317_v32 = vld [vmem:[%s891_s3 + $0x178] sm:$0xff]  ;;  %v299_v34 = vld [vmem:[%s891_s3 + $0xe8] sm:$0xff]  ;;  %s517_s5 = sshll.u32 %s228_s30, 3 }
  0x19   : > { %358 = vmatpush.msra.mxu2 %v315_v18  ;;  %378 = vmatpush.msra.mxu3 %v316_v19  ;;  %v298_v33 = vld [vmem:[%s891_s3 + $0xe0] sm:$0xff]  ;;  %v300_v35 = vld [vmem:[%s891_s3 + $0xf0] sm:$0xff]  ;;  %v313_v36 = vld [vmem:[%s891_s3 + $0x158] sm:$0xff]  ;;  %s230_s9 = scalar_lea.vmem %s892_s4, %s517_s5 }
  0x1a   : > { %395 = vmatpush.msrb.mxu0 %v329_v20  ;;  %339 = vmatpush.msra.mxu1 %v310_v21  ;;  %v294_v37 = vld [vmem:[%s891_s3 + $0xc0] sm:$0xff]  ;;  %v295_v38 = vld [vmem:[%s891_s3 + $0xc8] sm:$0xff]  ;;  %v296_v39 = vld [vmem:[%s891_s3 + $0xd0] sm:$0xff] }
  0x1b   : > { %359 = vmatpush.msra.mxu2 %v311_v22  ;;  %379 = vmatpush.msra.mxu3 %v312_v23  ;;  %v309_v40 = vld [vmem:[%s891_s3 + $0x138] sm:$0xff]  ;;  %v290_v41 = vld [vmem:[%s891_s3 + $0xa0] sm:$0xff]  ;;  %v291_v42 = vld [vmem:[%s891_s3 + $0xa8] sm:$0xff] }
  0x1c   : > { %396 = vmatpush.msrb.mxu0 %v325_v24  ;;  %340 = vmatpush.msra.mxu1 %v306_v25  ;;  %v292_v43 = vld [vmem:[%s891_s3 + $0xb0] sm:$0xff]  ;;  %v305_v44 = vld [vmem:[%s891_s3 + $0x118] sm:$0xff]  ;;  %v286_v45 = vld [vmem:[%s891_s3 + $0x80] sm:$0xff] }
  0x1d   : > { %360 = vmatpush.msra.mxu2 %v307_v26  ;;  %380 = vmatpush.msra.mxu3 %v308_v27  ;;  %v287_v46 = vld [vmem:[%s891_s3 + $0x88] sm:$0xff]  ;;  %v288_v47 = vld [vmem:[%s891_s3 + $0x90] sm:$0xff]  ;;  %v301_v48 = vld [vmem:[%s891_s3 + $0xf8] sm:$0xff] }
  0x1e   : > { %397 = vmatpush.msrb.mxu0 %v321_v28  ;;  %341 = vmatpush.msra.mxu1 %v302_v29  ;;  %v282_v49 = vld [vmem:[%s891_s3 + $0x60] sm:$0xff]  ;;  %v283_v50 = vld [vmem:[%s891_s3 + $0x68] sm:$0xff]  ;;  %v284_v51 = vld [vmem:[%s891_s3 + $0x70] sm:$0xff] }
  0x1f   : > { %361 = vmatpush.msra.mxu2 %v303_v30  ;;  %381 = vmatpush.msra.mxu3 %v304_v31  ;;  %v297_v52 = vld [vmem:[%s891_s3 + $0xd8] sm:$0xff]  ;;  %v278_v56 = vld [vmem:[%s891_s3 + $0x40] sm:$0xff]  ;;  %v279_v57 = vld [vmem:[%s891_s3 + $0x48] sm:$0xff] }
  0x20   : > { %398 = vmatpush.msrb.mxu0 %v317_v32  ;;  %342 = vmatpush.msra.mxu1 %v298_v33  ;;  %v293_v53 = vld [vmem:[%s891_s3 + $0xb8] sm:$0xff]  ;;  %v280_v58 = vld [vmem:[%s891_s3 + $0x50] sm:$0xff]  ;;  %v274_v60 = vld [vmem:[%s891_s3 + $0x20] sm:$0xff] }
  0x21   : > { %362 = vmatpush.msra.mxu2 %v299_v34  ;;  %382 = vmatpush.msra.mxu3 %v300_v35  ;;  %v289_v54 = vld [vmem:[%s891_s3 + $0x98] sm:$0xff]  ;;  %v275_v61 = vld [vmem:[%s891_s3 + $0x28] sm:$0xff]  ;;  %v276_v62 = vld [vmem:[%s891_s3 + $0x30] sm:$0xff] }
  0x22   : > { %399 = vmatpush.msrb.mxu0 %v313_v36  ;;  %343 = vmatpush.msra.mxu1 %v294_v37  ;;  %v285_v55 = vld [vmem:[%s891_s3 + $0x78] sm:$0xff]  ;;  %v270_v0 = vld [vmem:[%s891_s3] sm:$0xff]  ;;  %v271_v1 = vld [vmem:[%s891_s3 + $0x8] sm:$0xff] }
  0x23   : > { %363 = vmatpush.msra.mxu2 %v295_v38  ;;  %383 = vmatpush.msra.mxu3 %v296_v39  ;;  %v281_v59 = vld [vmem:[%s891_s3 + $0x58] sm:$0xff]  ;;  %v272_v2 = vld [vmem:[%s891_s3 + $0x10] sm:$0xff] }
  0x24   : > { %400 = vmatpush.msrb.mxu0 %v309_v40  ;;  %344 = vmatpush.msra.mxu1 %v290_v41  ;;  %v277_v63 = vld [vmem:[%s891_s3 + $0x38] sm:$0xff] }
  0x25   : > { %364 = vmatpush.msra.mxu2 %v291_v42  ;;  %384 = vmatpush.msra.mxu3 %v292_v43  ;;  %v273_v3 = vld [vmem:[%s891_s3 + $0x18] sm:$0xff] }
  0x26   : > { %401 = vmatpush.msrb.mxu0 %v305_v44  ;;  %345 = vmatpush.msra.mxu1 %v286_v45 }
  0x27   : > { %365 = vmatpush.msra.mxu2 %v287_v46  ;;  %385 = vmatpush.msra.mxu3 %v288_v47 }
  0x28   : > { %402 = vmatpush.msrb.mxu0 %v301_v48  ;;  %346 = vmatpush.msra.mxu1 %v282_v49 }
  0x29   : > { %366 = vmatpush.msra.mxu2 %v283_v50  ;;  %386 = vmatpush.msra.mxu3 %v284_v51 }
  0x2a   : > { %403 = vmatpush.msrb.mxu0 %v297_v52  ;;  %347 = vmatpush.msra.mxu1 %v278_v56 }
  0x2b   : > { %367 = vmatpush.msra.mxu2 %v279_v57  ;;  %387 = vmatpush.msra.mxu3 %v280_v58 }
  0x2c   : > { %404 = vmatpush.msrb.mxu0 %v293_v53  ;;  %348 = vmatpush.msra.mxu1 %v274_v60 }
  0x2d   : > { %368 = vmatpush.msra.mxu2 %v275_v61  ;;  %388 = vmatpush.msra.mxu3 %v276_v62 }
  0x2e   : > { %405 = vmatpush.msrb.mxu0 %v289_v54  ;;  %349 = vmatpush.msra.mxu1 %v270_v0 }
  0x2f   : > { %369 = vmatpush.msra.mxu2 %v271_v1  ;;  %389 = vmatpush.msra.mxu3 %v272_v2 }
  0x30   : > { %406 = vmatpush.msrb.mxu0 %v285_v55 }
  0x32   : > { %407 = vmatpush.msrb.mxu0 %v281_v59 }
  0x34   : > { %408 = vmatpush.msrb.mxu0 %v277_v63 }
  0x36   : > { %409 = vmatpush.msrb.mxu0 %v273_v3 }
  0x82   : > { %v238_v4 = vpop.permute.xlu0 %237 }
  0x94   : > { %v265_v5 = vpop.f32.mrf.mxu0 }
  0x95   : > { %v266_v6 = vadd.f32 %v265_v5, %v238_v4 }
  0x97   : > { %v268_v7 = vmax.f32 %v266_v6, 0.0 }
  0x99   : > { %v269_v8 = vmin.f32 %v268_v7, 6.0 }
  0x9b   : > { %350 = vmatmul.f32.vlgmr.msra.gmra.mxu1 %v269_v8  ;;  %370 = vmatmul.f32.vlgmr.msra.gmra.mxu2 %v269_v8 }
  0x9c   : > { %390 = vmatmul.f32.vlgmr.msra.gmra.mxu3 %v269_v8  ;;  %410 = vmatmul.f32.vlgmr.msrb.gmra.mxu0 %v269_v8 }
 0x118   : > { %v351_v9 = vpop.f32.mrf.mxu1 }
 0x119   : > { %414 = vst [vmem:[%s230_s9] sm:$0xff] %v351_v9  ;;  %v411_v10 = vpop.f32.mrf.mxu0 }
 0x11a   : > { %417 = vst [vmem:[%s230_s9 + $0x18] sm:$0xff] %v411_v10 }
 0x11e   : > { %v371_v11 = vpop.f32.mrf.mxu2 }
 0x11f   : > { %415 = vst [vmem:[%s230_s9 + $0x8] sm:$0xff] %v371_v11  ;;  %v391_v12 = vpop.f32.mrf.mxu3 }
 0x120   : > { %416 = vst [vmem:[%s230_s9 + $0x10] sm:$0xff] %v391_v12 }
 0x121 PF: > { %s14_s19 = sadd.s32 1, %s602_s19   ;;  %s893_s15 = smov %s594_s17 }
 0x122   : > { %p11_p8 = scmp.ge.s32.totalorder %s14_s19, 6   ;;  %s894_s16 = smov %s598_s18 }
 0x123   : > { %s895_s17 = smov %s898_s20  ;;  %s896_s18 = smov %s902_s21 }
 0x124   :  { %13 = sbr.rel (!%p11_p8) target bundleno = 3 (0x3), region = 66 }

</bundles_post_ra>
